<compile_context>
chip_gen: v7x
topology: tpu7x:2x2x1
jax: 0.10.0
libtpu: 0.0.40
codegen_flags: <defaults>
</compile_context>

<pallas_src>
import functools

import jax
import jax.numpy as jnp
from jax.experimental import pallas as pl
from jax.experimental.pallas import tpu as pltpu


def _round_up(v, m):
    return ((v + m - 1) // m) * m


def _pick_tile(padded, align, cap):
    """Largest divisor of `padded` that is a multiple of `align` and <= cap.

    `padded` is always a multiple of `align`, so the result is >= align.
    Choosing a divisor means dimensions are padded only to hardware alignment
    (8 sublanes / 128 lanes), never to the tile size.
    """
    cap = max(align, (int(cap) // align) * align)
    if padded <= cap:
        return padded
    for d in range(cap, align - 1, -align):
        if padded % d == 0:
            return d
    return align


def _default_tile_caps():
    """Generation-aware tile caps: bigger tiles on 128 MiB-VMEM chips."""
    vmem = 64 << 20
    try:
        info_fn = getattr(pltpu, "get_tpu_info", None)
        if info_fn is not None:
            vmem = getattr(info_fn(), "vmem_capacity_bytes", vmem) or vmem
    except Exception:
        pass
    if vmem >= (100 << 20):        # v5e / v6e / v5p: 128 MiB physical VMEM
        return 1024, 1024, 2048
    return 512, 512, 1024          # v7x: 64 MiB VMEM per TensorCore


_DEFAULT_TILE_CAPS = _default_tile_caps()


def prepare_regl_params(weight, bias):
    """One-time parameter prep (hoisted out of the per-call path).

    weight: (num_outputs, num_inputs) torch nn.Linear layout.
    bias:   (num_outputs,)
    Returns (w_kn, b2d): weight transposed to (Kp, Np) and bias as (1, Np),
    both zero-padded to 128-multiples along K and N.
    """
    N, K = weight.shape
    Kp, Np = _round_up(K, 128), _round_up(N, 128)
    w_kn = jnp.zeros((Kp, Np), weight.dtype).at[:K, :N].set(weight.T)
    b2d = jnp.zeros((1, Np), bias.dtype).at[0, :N].set(bias)
    return w_kn, b2d


def _regl_kernel(x_ref, w_ref, b_ref, o_ref):
    # x_ref: (tm, tk) activations tile
    # w_ref: (tk, tn) pre-transposed weight tile
    # b_ref: (1, tn)  bias tile
    # o_ref: (tm, tn) f32 output tile; resident across the K grid axis, so it
    #                 doubles as the accumulator (no scratch needed for f32).
    k = pl.program_id(2)

    @pl.when(k == 0)
    def _():
        o_ref[...] = jnp.zeros_like(o_ref)

    o_ref[...] += jnp.dot(x_ref[...], w_ref[...],
                          preferred_element_type=jnp.float32)

    @pl.when(k == pl.num_programs(2) - 1)
    def _():
        # bias broadcast over rows, then .clamp(min=0.0)
        o_ref[...] = jnp.maximum(o_ref[...] + b_ref[...], 0.0)


@functools.partial(jax.jit, static_argnames=("num_outputs", "tm", "tn", "tk"))
def regl_forward(x, w_kn, b2d, *, num_outputs, tm=None, tn=None, tk=None):
    """relu(x @ W^T + b) using params from prepare_regl_params.

    x:    (B, num_inputs)  float32
    w_kn: (Kp, Np)         float32 pre-transposed / pre-padded weight
    b2d:  (1, Np)          float32 pre-padded bias
    returns (B, num_outputs) float32
    """
    B, K = x.shape
    Kp, Np = w_kn.shape
    N = num_outputs
    dtype = x.dtype

    Mp = _round_up(B, 8)
    assert Kp == _round_up(K, 128), "w_kn K-padding does not match x"
    assert b2d.shape == (1, Np) and N <= Np

    tm_cap, tn_cap, tk_cap = _DEFAULT_TILE_CAPS
    tm = _pick_tile(Mp, 8, tm if tm is not None else tm_cap)
    tn = _pick_tile(Np, 128, tn if tn is not None else tn_cap)
    tk = _pick_tile(Kp, 128, tk if tk is not None else tk_cap)

    # v7x megacore: ensure the "parallel" axes expose >= 2 blocks when possible
    # (no-op on single-TC v5e/v6e). Halving keeps divisibility and alignment.
    if (Mp // tm) * (Np // tn) == 1:
        if tn % 256 == 0:
            tn //= 2
        elif tm % 16 == 0:
            tm //= 2

    # Pad x to hardware alignment only (<= 7 rows, <= 127 cols of zeros).
    xp = x if (Mp == B and Kp == K) else jnp.pad(x, ((0, Mp - B), (0, Kp - K)))

    grid = (Mp // tm, Np // tn, Kp // tk)
    gm, gn, _ = grid

    itemsize = jnp.dtype(dtype).itemsize
    # Explicit VMEM budget: double-buffered x, W, out tiles (+ bias) + headroom.
    buf_bytes = itemsize * (2 * tm * tk + 2 * tk * tn + 2 * tm * tn + 2 * tn)
    vmem_limit = int(min(max(buf_bytes + (4 << 20), 32 << 20), 96 << 20))

    cost = pl.CostEstimate(
        flops=2 * Mp * Np * Kp,
        transcendentals=0,
        # Count the actual re-streamed traffic (x streamed grid_n times, W
        # streamed grid_m times), not one pass per operand.
        bytes_accessed=itemsize * (Mp * Kp * gn + Kp * Np * gm + Mp * Np + Np),
    )

    out = pl.pallas_call(
        _regl_kernel,
        out_shape=jax.ShapeDtypeStruct((Mp, Np), dtype),
        grid_spec=pltpu.PrefetchScalarGridSpec(
            num_scalar_prefetch=0,
            grid=grid,
            in_specs=[
                pl.BlockSpec((tm, tk), lambda i, j, k: (i, k)),   # x  (Mp, Kp)
                pl.BlockSpec((tk, tn), lambda i, j, k: (k, j)),   # Wt (Kp, Np)
                pl.BlockSpec((1, tn), lambda i, j, k: (0, j)),    # b  (1, Np)
            ],
            out_specs=pl.BlockSpec((tm, tn), lambda i, j, k: (i, j)),
        ),
        compiler_params=pltpu.CompilerParams(
            dimension_semantics=("parallel", "parallel", "arbitrary"),
            vmem_limit_bytes=vmem_limit,
        ),
        cost_estimate=cost,
    )(xp, w_kn, b2d)

    # Skip the post-slice entirely when the shapes are already aligned.
    if Mp == B and Np == N:
        return out
    return out[:B, :N]


def _reference(x, weight, bias):
    return jnp.maximum(x @ weight.T + bias, 0.0)


if __name__ == "__main__":
    key = jax.random.PRNGKey(0)
    kx, kw, kb = jax.random.split(key, 3)

    # Small but multi-tile shapes: with tm=32, tn=128, tk=128 the grid is
    # (2, 2, 3), exercising the K accumulation and pl.when epilogue, plus a
    # non-128-aligned N to exercise the alignment-only padding path.
    B, num_inputs, num_outputs = 64, 384, 160

    x = jax.random.normal(kx, (B, num_inputs), dtype=jnp.float32)
    bound = 1.0 / (num_inputs ** 0.5)
    weight = jax.random.uniform(kw, (num_outputs, num_inputs),
                                minval=-bound, maxval=bound, dtype=jnp.float32)
    bias = jax.random.uniform(kb, (num_outputs,),
                              minval=-bound, maxval=bound, dtype=jnp.float32)

    # One-time parameter prep (hoisted out of the per-call path).
    w_kn, b2d = prepare_regl_params(weight, bias)

    # Small tile overrides purely to exercise multi-step tiling at test size.
    y_small = regl_forward(x, w_kn, b2d, num_outputs=num_outputs,
                           tm=32, tn=128, tk=128)
    jax.block_until_ready(y_small)

    # Production defaults (generation-aware tile caps + explicit VMEM budget).
    y = regl_forward(x, w_kn, b2d, num_outputs=num_outputs)
    jax.block_until_ready(y)

    y_ref = _reference(x, weight, bias)
    assert y.shape == (B, num_outputs)
    assert y_small.shape == (B, num_outputs)
    assert jnp.allclose(y_small, y_ref, atol=2e-5, rtol=2e-5)
    assert jnp.allclose(y, y_ref, atol=2e-5, rtol=2e-5)

    print("KERNEL_OK")
</pallas_src>

<mosaic_0001>
module attributes {stable_mosaic.version = 11 : i64} {
  func.func @_regl_kernel(%arg0: i32, %arg1: i32, %arg2: i32, %arg3: memref<32x128xf32, #tpu.memory_space<vmem>>, %arg4: memref<128x128xf32, #tpu.memory_space<vmem>>, %arg5: memref<1x128xf32, #tpu.memory_space<vmem>>, %arg6: memref<32x128xf32, #tpu.memory_space<vmem>>) attributes {dimension_semantics = [#tpu.dimension_semantics<parallel>, #tpu.dimension_semantics<parallel>, #tpu.dimension_semantics<arbitrary>], iteration_bounds = array<i64: 2, 2, 3>, scalar_prefetch = 0 : i64, scratch_operands = 0 : i64, tpu.core_type = #tpu.core_type<tc>, window_params = [{transform_indices = @transform_0, window_bounds = array<i64: 32, 128>}, {transform_indices = @transform_1, window_bounds = array<i64: 128, 128>}, {transform_indices = @transform_2, window_bounds = array<i64: 1, 128>}, {transform_indices = @transform_3, window_bounds = array<i64: 32, 128>}]} {
    %c0_i32 = arith.constant 0 : i32
    %0 = arith.cmpi eq, %arg2, %c0_i32 : i32
    %1 = arith.extui %0 : i1 to i32
    %c0_i32_0 = arith.constant 0 : i32
    %2 = arith.cmpi ne, %1, %c0_i32_0 : i32
    scf.if %2 {
      %cst_9 = arith.constant 0.000000e+00 : f32
      %12 = vector.broadcast %cst_9 : f32 to vector<32x128xf32>
      %c0_10 = arith.constant 0 : index
      %c0_11 = arith.constant 0 : index
      %13 = vector.load %arg6[%c0_10, %c0_11] : memref<32x128xf32, #tpu.memory_space<vmem>>, vector<32x128xf32>
      tpu.vector_store %arg6[%c0_10, %c0_11], %12 {strides = array<i32>} : memref<32x128xf32, #tpu.memory_space<vmem>>, vector<32x128xf32>,
    } else {
    }
    %c0 = arith.constant 0 : index
    %c0_1 = arith.constant 0 : index
    %3 = vector.load %arg6[%c0, %c0_1] : memref<32x128xf32, #tpu.memory_space<vmem>>, vector<32x128xf32>
    %c0_2 = arith.constant 0 : index
    %c0_3 = arith.constant 0 : index
    %4 = vector.load %arg3[%c0_2, %c0_3] : memref<32x128xf32, #tpu.memory_space<vmem>>, vector<32x128xf32>
    %c0_4 = arith.constant 0 : index
    %c0_5 = arith.constant 0 : index
    %5 = vector.load %arg4[%c0_4, %c0_5] : memref<128x128xf32, #tpu.memory_space<vmem>>, vector<128x128xf32>
    %cst = arith.constant dense<0.000000e+00> : vector<32x128xf32>
    %6 = tpu.matmul %4, %5, %cst {dimension_numbers = #tpu.dot_dimension_numbers<[1], [0], [0], [1], [0, 0, 1, 1], [], []>} : vector<32x128xf32>, vector<128x128xf32>, vector<32x128xf32> -> vector<32x128xf32>
    %7 = arith.addf %3, %6 : vector<32x128xf32>
    %c0_6 = arith.constant 0 : index
    %c0_7 = arith.constant 0 : index
    %8 = vector.load %arg6[%c0_6, %c0_7] : memref<32x128xf32, #tpu.memory_space<vmem>>, vector<32x128xf32>
    tpu.vector_store %arg6[%c0_6, %c0_7], %7 {strides = array<i32>} : memref<32x128xf32, #tpu.memory_space<vmem>>, vector<32x128xf32>,
    %c2_i32 = arith.constant 2 : i32
    %9 = arith.cmpi eq, %arg2, %c2_i32 : i32
    %10 = arith.extui %9 : i1 to i32
    %c0_i32_8 = arith.constant 0 : i32
    %11 = arith.cmpi ne, %10, %c0_i32_8 : i32
    scf.if %11 {
      %c0_9 = arith.constant 0 : index
      %c0_10 = arith.constant 0 : index
      %12 = vector.load %arg6[%c0_9, %c0_10] : memref<32x128xf32, #tpu.memory_space<vmem>>, vector<32x128xf32>
      %c0_11 = arith.constant 0 : index
      %c0_12 = arith.constant 0 : index
      %13 = vector.load %arg5[%c0_11, %c0_12] : memref<1x128xf32, #tpu.memory_space<vmem>>, vector<1x128xf32>
      %14 = vector.broadcast %13 : vector<1x128xf32> to vector<32x128xf32>
      %15 = arith.addf %12, %14 : vector<32x128xf32>
      %cst_13 = arith.constant 0.000000e+00 : f32
      %16 = vector.broadcast %cst_13 : f32 to vector<32x128xf32>
      %17 = arith.maximumf %15, %16 : vector<32x128xf32>
      %c0_14 = arith.constant 0 : index
      %c0_15 = arith.constant 0 : index
      %18 = vector.load %arg6[%c0_14, %c0_15] : memref<32x128xf32, #tpu.memory_space<vmem>>, vector<32x128xf32>
      tpu.vector_store %arg6[%c0_14, %c0_15], %17 {strides = array<i32>} : memref<32x128xf32, #tpu.memory_space<vmem>>, vector<32x128xf32>,
    } else {
    }
    return
  }
  func.func @transform_0(%arg0: i32, %arg1: i32, %arg2: i32) -> (i32, i32) {
    %c0_i32 = arith.constant 0 : i32
    return %arg0, %arg2 : i32, i32
  }
  func.func @transform_1(%arg0: i32, %arg1: i32, %arg2: i32) -> (i32, i32) {
    %c0_i32 = arith.constant 0 : i32
    return %arg2, %arg1 : i32, i32
  }
  func.func @transform_2(%arg0: i32, %arg1: i32, %arg2: i32) -> (i32, i32) {
    %c0_i32 = arith.constant 0 : i32
    %c0_i32_0 = arith.constant 0 : i32
    return %c0_i32, %arg1 : i32, i32
  }
  func.func @transform_3(%arg0: i32, %arg1: i32, %arg2: i32) -> (i32, i32) {
    %c0_i32 = arith.constant 0 : i32
    return %arg0, %arg1 : i32, i32
  }
}

</mosaic_0001>

<bundles_post_ra>
// kernel: regl_forward.1
= control target key start
LH: loop header
LB: loop body
LE: loop exit
PB: predicated region body
PF: predicated region fallthrough
CT: control target
= control target key end

     0   :  { %s1565_s0 = inlined_call_operand.hbm [shape: f32[64,384], index: 0, kind: input, shape index: {}]   ;;  %s1566_s1 = inlined_call_operand.hbm [shape: f32[384,256], index: 1, kind: input, shape index: {}]   ;;  %s1567_s2 = inlined_call_operand.vmem [shape: f32[1,256], index: 2, kind: input, shape index: {}]   ;;  %s1568_s3 = inlined_call_operand.hbm [shape: f32[64,256], index: 3, kind: output, shape index: {}]  }
   0x1   :  { %1585 = sst [smem:[#allocation20_spill]] %s1565_s0 }
   0x2   :  { %1586 = sst [smem:[#allocation21_spill]] %s1567_s2 }
   0x3   :  { %1587 = sst [smem:[#allocation22_spill]] %s1568_s3 }
   0x4   :  { %8 = vsyncpa [#allocation3], 0 }
   0x5   :  { %10 = vsyncpa [#allocation3 + $0x1], 0 }
   0x6   :  { %11 = vsyncpa [#allocation6], 0 }
   0x7   :  { %13 = vsyncpa [#allocation6 + $0x1], 0 }
   0x8   :  { %14 = vsyncpa [#allocation4], 0 }
   0x9   :  { %16 = vsyncpa [#allocation4 + $0x1], 0  ;;  %s1119_s12 = smov 0   ;;  %s1121_s13 = smov 0  }
   0xa   :  { %s1123_s14 = smov 0   ;;  %s1125_s15 = smov 0  }
   0xb   :  { %s1127_s16 = smov 0   ;;  %s1129_s17 = smov 0  }
   0xc   :  { %s1131_s18 = smov 0   ;;  %s1133_s19 = smov 0  }
   0xd   :  { %s1135_s20 = smov 0   ;;  %s1137_s21 = smov 0  }
   0xe   :  { %s1139_s22 = smov 0   ;;  %s1141_s23 = smov 0  }
   0xf   :  { %s1143_s24 = smov 0   ;;  %s1145_s25 = smov 0  }
  0x10   :  { %s1147_s26 = smov 0   ;;  %s1149_s27 = smov 0  }
  0x11 LB: > { %1588 = sst [smem:[#allocation11_spill]] %s1062_s21  ;;  %s571_s28 = sadd.s32 4294967295, %s1086_s27   ;;  %s1086_s27 = sphi %s1149_s27, %s22_s27   ;;  %s1082_s26 = sphi %s1147_s26, %s1635_s26   ;;  %s1078_s25 = sphi %s1145_s25, %s1648_s25   ;;  %s1074_s24 = sphi %s1143_s24, %s1647_s24   ;;  %s1070_s23 = sphi %s1141_s23, %s1632_s23   ;;  %s1066_s22 = sphi %s1139_s22, %s1646_s22   ;;  %s1062_s21 = sphi %s1137_s21, %s1645_s21   ;;  %s1058_s20 = sphi %s1135_s20, %s1644_s20   ;;  %s1054_s19 = sphi %s1133_s19, %s1643_s19   ;;  %s1050_s18 = sphi %s1131_s18, %s1642_s18   ;;  %s1046_s17 = sphi %s1129_s17, %s1641_s17   ;;  %s1042_s16 = sphi %s1127_s16, %s1640_s16   ;;  %s1038_s15 = sphi %s1125_s15, %s1639_s15   ;;  %s1034_s14 = sphi %s1123_s14, %s1638_s14   ;;  %s1030_s13 = sphi %s1121_s13, %s1637_s13   ;;  %s1026_s12 = sphi %s1119_s12, %s1636_s12  }
  0x12   : > { %1589 = sst [smem:[#allocation12_spill]] %s1066_s22  ;;  %s34_s29 = sadd.s32 1, %s1074_s24 }
  0x13   : > { %1590 = sst [smem:[#allocation13_spill]] %s1070_s23  ;;  %p1199_p0 = scmp.ge.s32.totalorder %s34_s29, 3 }
  0x14   : > { %1591 = sst [smem:[#allocation14_spill]] %s1082_s26  ;;  %p57_p1 = scmp.ne.s32.totalorder %s1058_s20, %s1054_s19 }
  0x15   : > { %s1650_s29 = smov (%p1199_p0, %s34_s29), 0  ;;  %p1572_p2 = scmp.eq.s32.totalorder %s1086_s27, 0 }
  0x16   : > { %1593 = sst [smem:[#allocation15_spill]] %s1650_s29  ;;  %p63_p3 = scmp.ne.s32.totalorder %s1054_s19, %s1050_s18 }
  0x17   : > { %s1215_s6 = ssub.s32 %s1074_s24, %s1650_s29  ;;  %p1217_p4 = scmp.eq.s32.totalorder %s571_s28, 0 }
  0x18   : > { %p59_p5 = por %p1572_p2, %p57_p1  ;;  %p1223_p6 = scmp.eq.s32.totalorder %s571_s28, 11 }
  0x19   : > { %s1594_s7 = scalar_select %p1217_p4, 1, 0 }
  0x1a   : > { %s1595_s8 = scalar_select %p1223_p6, 1, 0 }
  0x1b   : > { %p1229_p7 = por %p1217_p4, %p63_p3  ;;  %p1571_p8 = scmp.lt.s32.totalorder %s1086_s27, 12 }
  0x1c   : > { %s169_s10 = sand.u32 1, %s1058_s20   ;;  %s704_s18 = smul.u32 12, %s1082_s26 }
  0x1d   : > { %s1596_s9 = scalar_select %p1229_p7, 1, 0 }
  0x1e   : > { %s575_s11 = sshll.u32 %s169_s10, 5  ;;  %p1238_p9 = pnand %p1571_p8, %p59_p5 }
  0x1f   : > { %s173_s5 = scalar_lea.vmem [#allocation2], %s575_s11  ;;  %s179_s28 = sadd.s32 %s1074_s24, %s704_s18 }
  0x20   : > { %s182_s4 = sshll.u32 %s173_s5, 4  ;;  %s578_s3 = sshll.u32 %s179_s28, 7  ;;  %s1243_s4 = int_to_ptr.vmem [resolvable:$true] %s182_s4 }
  0x21   : > { %s1598_s0 = sld [smem:[#allocation20_spill]]  ;;  %s1250_s5 = scalar_lea.sflag [#allocation3], %s169_s10 }
  0x22   : > { %p862_p11 = pneg %p1238_p9 }
  0x27   : > { %s1248_s2 = scalar_lea.hbm %s1598_s0, %s578_s3  ;;  %s865_s21 = scalar_lea.hbm %s1598_s0, 3072 }
  0x28   : > { %s860_s11 = scalar_lea.hbm %s1248_s2, 512  ;;  %p866_p1 = scmp.lt.u32.totalorder %s1248_s2, %s1598_s0 }
  0x29   : > { %p861_p10 = scmp.ne.s32.totalorder %s1248_s2, %s860_s11  ;;  %p867_p3 = scmp.lt.u32.totalorder %s865_s21, %s860_s11 }
  0x2a   : > { %p869_p8 = scmp.lt.u32.totalorder %s860_s11, %s1248_s2 }
  0x2b   : > { %p863_p12 = pnand %p862_p11, %p861_p10  ;;  %p868_p5 = por %p867_p3, %p866_p1 }
  0x2d   : > { %p864_p13 = pneg %p863_p12  ;;  %p870_p2 = por %p869_p8, %p868_p5 }
  0x2f   : > { %p871_p7 = pnand %p870_p2, %p864_p13 }
  0x31   : > { %874 = shalt.err (!%p871_p7)
}
  0x32   : > { %s875_s10 = scalar_lea.vmem %s1243_s4, 512  ;;  %s1088_s18 = smov [#allocation2]  }
  0x33   : > { %p876_p10 = scmp.ne.s32.totalorder %s1243_s4, %s875_s10  ;;  %s880_s28 = sshll.u32 %s1088_s18, 4  ;;  %s881_s28 = int_to_ptr.vmem [resolvable:$false] %s880_s28 }
  0x34   : > { %s882_s3 = scalar_lea.vmem %s881_s28, 1024  ;;  %p883_p4 = scmp.lt.s32.totalorder %s1243_s4, %s881_s28 }
  0x35   : > { %p878_p12 = pnand %p876_p10, %p862_p11  ;;  %p884_p1 = scmp.lt.s32.totalorder %s882_s3, %s875_s10 }
  0x37   : > { %p879_p6 = pneg %p878_p12  ;;  %p885_p3 = por %p884_p1, %p883_p4 }
  0x39   : > { %p886_p8 = pnand %p885_p3, %p879_p6 }
  0x3b   : > { %889 = shalt.err (!%p886_p8)
}
  0x3c   : > { %s1089_s11 = smov 384   ;;  %s1575_s21 = smov 128  }
  0x3d   : > { %s1576_s23 = smov 8   ;;  %p583_p2 = scmp.ge.s32.totalorder %s1086_s27, 1 }
  0x3e   : > { %714 = dma.hbm_to_vmem [thread:$0]  (!%p1238_p9), %s1248_s2, 512, %s1243_s4, %s1250_s5, %s1089_s11, %s1575_s21, %s1576_s23  }
  0x3f   : > { %p219_p4 = scmp.lt.s32.totalorder %s1086_s27, 13  ;;  %s572_s18 = sadd.s32 4294967294, %s1086_s27  }
  0x40   : > { %s37_s28 = sadd.s32 1, %s1078_s25  ;;  %s78_s3 = sadd.s32 1, %s1046_s17 }
  0x41   : > { %p1282_p6 = pnand %p583_p2, %p219_p4  ;;  %s1652_s28 = smov (!%p1199_p0, %s37_s28), %s1078_s25 }
  0x42   : > { %p85_p7 = scmp.ne.s32.totalorder %s1046_s17, %s1042_s16  ;;  %p91_p9 = scmp.ne.s32.totalorder %s1042_s16, %s1038_s15 }
  0x43   : > { %p39_p11 = scmp.ge.s32.totalorder %s1652_s28, 2  ;;  %s132_s2 = sadd.s32 1, %s1034_s14 }
  0x44   : > { %p1600_p13 = scmp.eq.s32.totalorder %s1086_s27, 0  ;;  %p1602_p10 = scmp.ne.s32.totalorder %s1594_s7, 0 }
  0x45   : > { %s1654_s28 = smov (%p39_p11, %s1652_s28), 0  ;;  %s1605_s30 = sadd.s32 1, %s1082_s26 }
  0x46   : > { %p1299_p5 = por %p85_p7, %p1600_p13  ;;  %p1305_p12 = por %p91_p9, %p1602_p10 }
  0x47   : > { %1604 = sst [smem:[#allocation16_spill]] %s1654_s28  ;;  %s1656_s30 = smov (!%p39_p11, %s1605_s30), %s1082_s26 }
  0x48   : > { %s1603_s4 = scalar_select %p1305_p12, 1, 0 }
  0x49   : > { %s74_s15 = ssub.s32 %s1078_s25, %s1654_s28  ;;  %p142_p0 = scmp.ne.s32.totalorder %s1034_s14, %s1030_s13 }
  0x4a   : > { %p43_p1 = scmp.ge.s32.totalorder %s1656_s30, 2  ;;  %s75_s5 = sor.u32 %s74_s15, %s1215_s6 }
  0x4b   : > { %p76_p3 = scmp.eq.s32.totalorder %s75_s5, 0  ;;  %p1606_p8 = scmp.ne.s32.totalorder %s1595_s8, 0 }
  0x4c   : > { %s1658_s30 = smov (%p43_p1, %s1656_s30), 0  ;;  %p148_p4 = scmp.ne.s32.totalorder %s1030_s13, %s1026_s12 }
  0x4d   : > { %p1321_p2 = por %p1606_p8, %p142_p0  ;;  %1609 = sst [smem:[#allocation18_spill]] %s1658_s30 }
  0x4e   : > { %s1328_s11 = scalar_select %p76_p3, %s1046_s17, %s78_s3  }
  0x4f   : > { %s1607_s7 = scalar_select %p1321_p2, 1, 0 }
  0x50   : > { %1610 = sst [smem:[#allocation19_spill]] %s1328_s11  ;;  %s45_s21 = ssub.s32 %s1082_s26, %s1658_s30 }
  0x51   : > { %1608 = sst [smem:[#allocation17_spill]] %s1607_s7  ;;  %s47_s23 = sor.u32 %s1215_s6, %s45_s21 }
  0x52   : > { %s129_s0 = sor.u32 %s74_s15, %s45_s21  ;;  %p48_p7 = scmp.eq.s32.totalorder %s47_s23, 0 }
  0x53   : > { %p130_p9 = scmp.eq.s32.totalorder %s129_s0, 0  ;;  %p149_p11 = scmp.eq.s32.totalorder %s572_s18, 11 }
  0x54   : > { %s192_s8 = sand.u32 1, %s1046_s17   ;;  %s1611_s5 = sadd.s32 1, %s1058_s20 }
  0x55   : > { %s1339_s28 = scalar_select %p48_p7, %s1058_s20, %s1611_s5  }
  0x56   : > { %s1342_s7 = scalar_select %p130_p9, %s1034_s14, %s132_s2  }
  0x57   : > { %p1344_p13 = por %p149_p11, %p148_p4  ;;  %s579_s3 = sshll.u32 %s192_s8, 7 }
  0x58   : > { %s596_s30 = sshll.u32 %s1074_s24, 5  ;;  %s196_s21 = scalar_lea.vmem [#allocation5], %s579_s3 }
  0x59   : > { %s1612_s22 = scalar_select %p1344_p13, 1, 0 }
  0x5a   : > { %s202_s26 = sadd.s32 %s1078_s25, %s596_s30  ;;  %s205_s15 = sshll.u32 %s196_s21, 4  ;;  %s1355_s15 = int_to_ptr.vmem [resolvable:$true] %s205_s15 }
  0x5b   : > { %s582_s6 = sshll.u32 %s202_s26, 7  ;;  %p1613_p10 = scmp.lt.s32.totalorder %s1086_s27, 12 }
  0x5c   : > { %s1353_s0 = scalar_lea.hbm %s1566_s1, %s582_s6  ;;  %s1365_s26 = scalar_lea.sflag [#allocation6], %s192_s8 }
  0x5d   : > { %p1361_p0 = pnand %p1613_p10, %p1299_p5  ;;  %s890_s2 = scalar_lea.hbm %s1353_s0, 2048 }
  0x5e   : > { %p891_p1 = scmp.ne.s32.totalorder %s1353_s0, %s890_s2  ;;  %s895_s29 = scalar_lea.hbm %s1566_s1, 12288 }
  0x5f   : > { %p892_p3 = pneg %p1361_p0  ;;  %p896_p5 = scmp.lt.u32.totalorder %s1353_s0, %s1566_s1 }
  0x60   : > { %p897_p7 = scmp.lt.u32.totalorder %s895_s29, %s890_s2  ;;  %p899_p11 = scmp.lt.u32.totalorder %s890_s2, %s1353_s0 }
  0x61   : > { %p893_p8 = pnand %p892_p3, %p891_p1 }
  0x62   : > { %p898_p9 = por %p897_p7, %p896_p5 }
  0x63   : > { %p894_p4 = pneg %p893_p8 }
  0x64   : > { %p900_p10 = por %p899_p11, %p898_p9 }
  0x66   : > { %p901_p13 = pnand %p900_p10, %p894_p4 }
  0x68   : > { %904 = shalt.err (!%p901_p13)
}
  0x69   : > { %s905_s8 = scalar_lea.vmem %s1355_s15, 2048  ;;  %s1092_s6 = smov [#allocation5]  }
  0x6a   : > { %p906_p1 = scmp.ne.s32.totalorder %s1355_s15, %s905_s8  ;;  %s910_s21 = sshll.u32 %s1092_s6, 4  ;;  %s911_s21 = int_to_ptr.vmem [resolvable:$false] %s910_s21 }
  0x6b   : > { %s912_s23 = scalar_lea.vmem %s911_s21, 4096  ;;  %p913_p12 = scmp.lt.s32.totalorder %s1355_s15, %s911_s21 }
  0x6c   : > { %p908_p8 = pnand %p906_p1, %p892_p3  ;;  %p914_p5 = scmp.lt.s32.totalorder %s912_s23, %s905_s8 }
  0x6e   : > { %p909_p2 = pneg %p908_p8  ;;  %p915_p7 = por %p914_p5, %p913_p12 }
  0x70   : > { %p916_p9 = pnand %p915_p7, %p909_p2 }
  0x72   : > { %919 = shalt.err (!%p916_p9)
}
  0x73   : > { %s1093_s2 = smov 256   ;;  %s1615_s30 = smov 8  }
  0x74   : > { %s1616_s11 = smov 128   ;;  %223 = sbr.rel (%p1282_p6) target bundleno = 438 (0x1b6), region = 32 }
  0x75   : > { %717 = dma.hbm_to_vmem [thread:$0]  (!%p1361_p0), %s1353_s0, 2048, %s1355_s15, %s1365_s26, %s1093_s2, %s1616_s11, %s1615_s30  }
  0x76   : > { %s225_s29 = sand.u32 (!%p1282_p6), 1, %s1054_s19   ;;  %p1617_p12 = scmp.ne.s32.totalorder (!%p1282_p6), %s1596_s9, 0 }
  0x77   : > { %s584_s5 = sshll.u32 (!%p1282_p6), %s225_s29, 5  ;;  %s226_s3 = scalar_lea.sflag (!%p1282_p6), [#allocation3], %s225_s29 }
  0x78   : > { %s1398_s8 = scalar_lea.vmem (!%p1282_p6), [#allocation2], %s584_s5 }
  0x7b   : > { %1013 = dma.done.wait (%p1617_p12), %s226_s3, 512  }
  0x7c   : > { %1015 = vsyncadd (%p1617_p12), %s226_s3, 4294966784  ;;  %s234_s18 = sand.u32 1, %s1042_s16   ;;  %p1618_p6 = scmp.ne.s32.totalorder %s1603_s4, 0 }
  0x7d   : > { %s585_s6 = sshll.u32 %s234_s18, 7  ;;  %s235_s15 = scalar_lea.sflag [#allocation6], %s234_s18 }
  0x7e   : > { %s1405_s0 = scalar_lea.vmem [#allocation5], %s585_s6 }
  0x7f   : > { %1017 = dma.done.wait (%p1618_p6), %s235_s15, 2048  }
  0x80   : > { %1019 = vsyncadd (%p1618_p6), %s235_s15, 4294965248  ;;  %s1619_s10 = sld [smem:[#allocation12_spill]]  ;;  %s266_s26 = sand.u32 1, %s1030_s13  }
  0x81   : > { %s586_s9 = sshll.u32 %s266_s26, 5  ;;  %s1620_s2 = sld [smem:[#allocation21_spill]] }
  0x82   : > { %s1422_s11 = scalar_lea.vmem [#allocation7], %s586_s9  ;;  %s1621_s29 = sld [smem:[#allocation11_spill]] }
  0x86   : > { %p271_p2 = scmp.lt.s32.totalorder %s1619_s10, 1 }
  0x88   : > { %s1660_s10 = smov (!%p271_p2, %s1619_s10), 1  ;;  %p587_p13 = scmp.ne.s32.totalorder %s1621_s29, 0 }
  0x89   : > { %s273_s30 = scalar_lea.vmem %s1620_s2, %s1660_s10  ;;  %v1094_v0 = vmov (!%p587_p13), 0.0  }
  0x8a   : > { %278 = sbr.rel (%p587_p13) target bundleno = 145 (0x91), region = 44  ;;  %279 = vst [vmem:[%s1422_s11] sm:$0xff] (!%p587_p13), %v1094_v0  ;;  %280 = vst [vmem:[%s1422_s11 + $0x8] sm:$0xff] (!%p587_p13), %v1094_v0 }
  0x8b   : > { %281 = vst [vmem:[%s1422_s11 + $0x10] sm:$0xff] (!%p587_p13), %v1094_v0  ;;  %282 = vst [vmem:[%s1422_s11 + $0x18] sm:$0xff] (!%p587_p13), %v1094_v0 }
  0x91 PF: > { %v291_v1 = vld [vmem:[%s1405_s0] sm:$0xff]  ;;  %v292_v2 = vld [vmem:[%s1405_s0 + $0x8] sm:$0xff]  ;;  %v293_v3 = vld [vmem:[%s1405_s0 + $0x10] sm:$0xff]  ;;  %s1622_s4 = sld [smem:[#allocation11_spill]] }
  0x92   : > { %v656_v4 = vpack.c.bf16 %v292_v2, %v291_v1  ;;  %v294_v5 = vld [vmem:[%s1405_s0 + $0x18] sm:$0xff]  ;;  %v295_v7 = vld [vmem:[%s1405_s0 + $0x20] sm:$0xff]  ;;  %v296_v8 = vld [vmem:[%s1405_s0 + $0x28] sm:$0xff] }
  0x93   : > { %v660_v6 = vpack.c.bf16 %v294_v5, %v293_v3  ;;  %v664_v9 = vpack.c.bf16 %v296_v8, %v295_v7  ;;  %v287_v10 = vld [vmem:[%s1398_s8] sm:$0xff]  ;;  %v289_v11 = vld [vmem:[%s1398_s8 + $0x10] sm:$0xff]  ;;  %v298_v13 = vld [vmem:[%s1405_s0 + $0x38] sm:$0xff] }
  0x94   : > { %657 = vmatprep.subr.bf16.mxu0 %v656_v4  ;;  %688 = vmatprep.subr.bf16.mxu1 %v656_v4  ;;  %v297_v12 = vld [vmem:[%s1405_s0 + $0x30] sm:$0xff]  ;;  %v299_v15 = vld [vmem:[%s1405_s0 + $0x40] sm:$0xff]  ;;  %v300_v16 = vld [vmem:[%s1405_s0 + $0x48] sm:$0xff] }
  0x95   : > { %659 = vmatpush3.bf16.msra.mxu0 %v656_v4  ;;  %696 = vmatpush3.bf16.msra.mxu1 %v656_v4  ;;  %v668_v14 = vpack.c.bf16 %v298_v13, %v297_v12  ;;  %v672_v17 = vpack.c.bf16 %v300_v16, %v299_v15  ;;  %v301_v18 = vld [vmem:[%s1405_s0 + $0x50] sm:$0xff]  ;;  %v302_v19 = vld [vmem:[%s1405_s0 + $0x58] sm:$0xff]  ;;  %v303_v21 = vld [vmem:[%s1405_s0 + $0x60] sm:$0xff] }
  0x96   : > { %661 = vmatprep.subr.bf16.mxu0 %v660_v6  ;;  %689 = vmatprep.subr.bf16.mxu1 %v660_v6  ;;  %v676_v20 = vpack.c.bf16 %v302_v19, %v301_v18  ;;  %v304_v22 = vld [vmem:[%s1405_s0 + $0x68] sm:$0xff]  ;;  %v305_v24 = vld [vmem:[%s1405_s0 + $0x70] sm:$0xff]  ;;  %v306_v25 = vld [vmem:[%s1405_s0 + $0x78] sm:$0xff] }
  0x97   : > { %650 = vmatprep.mubr.f32.mxu0 %v287_v10  ;;  %653 = vmatprep.mubr.f32.mxu1 %v289_v11  ;;  %v680_v23 = vpack.c.bf16 %v304_v22, %v303_v21  ;;  %v684_v26 = vpack.c.bf16 %v306_v25, %v305_v24  ;;  %v288_v27 = vld [vmem:[%s1398_s8 + $0x8] sm:$0xff]  ;;  %v290_v28 = vld [vmem:[%s1398_s8 + $0x18] sm:$0xff]  ;;  %v283_v31 = vld [vmem:[%s1422_s11] sm:$0xff]  ;;  %p588_p0 = scmp.ne.s32.totalorder %s1622_s4, 2 }
  0x98   : > { %v284_v29 = vld [vmem:[%s1422_s11 + $0x8] sm:$0xff]  ;;  %v286_v30 = vld [vmem:[%s1422_s11 + $0x18] sm:$0xff]  ;;  %v285_v32 = vld [vmem:[%s1422_s11 + $0x10] sm:$0xff] }
  0x99   : > { %663 = vmatpush3.bf16.msra.mxu0 %v660_v6  ;;  %697 = vmatpush3.bf16.msra.mxu1 %v660_v6  ;;  %v589_v42 = vld [vmem:[%s273_s30] ss:$0 sm:$0xff] (!%p588_p0) }
  0x9a   : > { %665 = vmatprep.subr.bf16.mxu0 %v664_v9  ;;  %690 = vmatprep.subr.bf16.mxu1 %v664_v9 }
  0x9d   : > { %667 = vmatpush3.bf16.msra.mxu0 %v664_v9  ;;  %698 = vmatpush3.bf16.msra.mxu1 %v664_v9 }
  0x9e   : > { %669 = vmatprep.subr.bf16.mxu0 %v668_v14  ;;  %691 = vmatprep.subr.bf16.mxu1 %v668_v14 }
  0xa1   : > { %671 = vmatpush3.bf16.msra.mxu0 %v668_v14  ;;  %699 = vmatpush3.bf16.msra.mxu1 %v668_v14 }
  0xa2   : > { %673 = vmatprep.subr.bf16.mxu0 %v672_v17  ;;  %692 = vmatprep.subr.bf16.mxu1 %v672_v17 }
  0xa5   : > { %675 = vmatpush3.bf16.msra.mxu0 %v672_v17  ;;  %700 = vmatpush3.bf16.msra.mxu1 %v672_v17 }
  0xa6   : > { %677 = vmatprep.subr.bf16.mxu0 %v676_v20  ;;  %693 = vmatprep.subr.bf16.mxu1 %v676_v20 }
  0xa9   : > { %679 = vmatpush3.bf16.msra.mxu0 %v676_v20  ;;  %701 = vmatpush3.bf16.msra.mxu1 %v676_v20 }
  0xaa   : > { %681 = vmatprep.subr.bf16.mxu0 %v680_v23  ;;  %694 = vmatprep.subr.bf16.mxu1 %v680_v23 }
  0xad   : > { %683 = vmatpush3.bf16.msra.mxu0 %v680_v23  ;;  %702 = vmatpush3.bf16.msra.mxu1 %v680_v23 }
  0xae   : > { %685 = vmatprep.subr.bf16.mxu0 %v684_v26  ;;  %695 = vmatprep.subr.bf16.mxu1 %v684_v26 }
  0xb1   : > { %687 = vmatpush3.bf16.msra.mxu0 %v684_v26  ;;  %703 = vmatpush3.bf16.msra.mxu1 %v684_v26 }
  0xb4   : > { %651 = vmatmul.mubr.f32.vlgmr.msra.gmra.mrb[0].mxu0 %v288_v27  ;;  %654 = vmatmul.mubr.f32.vlgmr.msra.gmra.mrb[0].mxu1 %v290_v28 }
 0x185   : > { %403 = sbr.rel (%p588_p0) target bundleno = 408 (0x198), region = 48 }
 0x187   : > { %v652_v33 = vpop.f32.mrb[0].mxu0  ;;  %v655_v34 = vpop.f32.mrb[0].mxu1 }
 0x188   : > { %v393_v35 = vadd.f32 %v652_v33, %v284_v29  ;;  %v395_v36 = vadd.f32 %v655_v34, %v286_v30  ;;  %v373_v37 = vpop.f32.mrb[1].mxu0  ;;  %v383_v38 = vpop.f32.mrb[1].mxu1 }
 0x189   : > { %v392_v39 = vadd.f32 %v373_v37, %v283_v31  ;;  %v394_v40 = vadd.f32 %v383_v38, %v285_v32 }
 0x18a   : > { %397 = vst [vmem:[%s1422_s11 + $0x8] sm:$0xff] %v393_v35  ;;  %399 = vst [vmem:[%s1422_s11 + $0x18] sm:$0xff] %v395_v36 }
 0x18b   : > { %396 = vst [vmem:[%s1422_s11] sm:$0xff] %v392_v39  ;;  %398 = vst [vmem:[%s1422_s11 + $0x10] sm:$0xff] %v394_v40 }
 0x191   : > { %v405_v43 = vld [vmem:[%s1422_s11 + $0x8] sm:$0xff]  ;;  %v407_v47 = vld [vmem:[%s1422_s11 + $0x18] sm:$0xff] }
 0x192   : > { %v404_v41 = vld [vmem:[%s1422_s11] sm:$0xff]  ;;  %v416_v45 = vadd.f32 %v589_v42, %v405_v43  ;;  %v406_v46 = vld [vmem:[%s1422_s11 + $0x10] sm:$0xff]  ;;  %v418_v49 = vadd.f32 %v589_v42, %v407_v47 }
 0x193   : > { %v415_v44 = vadd.f32 %v589_v42, %v404_v41  ;;  %v417_v48 = vadd.f32 %v589_v42, %v406_v46 }
 0x194   : > { %v420_v51 = vmax.f32 %v416_v45, 0.0  ;;  %v422_v53 = vmax.f32 %v418_v49, 0.0 }
 0x195   : > { %v419_v50 = vmax.f32 %v415_v44, 0.0  ;;  %v421_v52 = vmax.f32 %v417_v48, 0.0 }
 0x196   : > { %424 = vst [vmem:[%s1422_s11 + $0x8] sm:$0xff] %v420_v51  ;;  %426 = vst [vmem:[%s1422_s11 + $0x18] sm:$0xff] %v422_v53 }
 0x197   : > { %423 = vst [vmem:[%s1422_s11] sm:$0xff] %v419_v50  ;;  %425 = vst [vmem:[%s1422_s11 + $0x10] sm:$0xff] %v421_v52 }
 0x198 PF: > { %s1624_s18 = sld [smem:[#allocation13_spill]]  ;;  %s1625_s6 = sld [smem:[#allocation12_spill]] }
 0x199   : > { %s1626_s15 = sld [smem:[#allocation17_spill]]  ;;  %s443_s9 = sshll.u32 %s1422_s11, 4  ;;  %s1474_s9 = int_to_ptr.vmem [resolvable:$true] %s443_s9 }
 0x19a   : > { %s1627_s30 = sld [smem:[#allocation22_spill]]  ;;  %s1483_s4 = scalar_lea.sflag [#allocation4], %s266_s26 }
 0x19b   : > { %s920_s5 = scalar_lea.vmem %s1474_s9, 512  ;;  %s1095_s11 = smov [#allocation7]  }
 0x19c   : > { %p921_p3 = scmp.ne.s32.totalorder %s1474_s9, %s920_s5  ;;  %s924_s3 = sshll.u32 %s1095_s11, 4  ;;  %s925_s3 = int_to_ptr.vmem [resolvable:$false] %s924_s3 }
 0x19d   : > { %s926_s8 = scalar_lea.vmem %s925_s3, 1024  ;;  %p927_p1 = scmp.lt.s32.totalorder %s1474_s9, %s925_s3 }
 0x19e   : > { %s597_s0 = sshll.u32 %s1624_s18, 3  ;;  %p928_p8 = scmp.lt.s32.totalorder %s926_s8, %s920_s5 }
 0x19f   : > { %s440_s10 = sadd.s32 %s1625_s6, %s597_s0  ;;  %p1628_p4 = scmp.ne.s32.totalorder %s1626_s15, 0 }
 0x1a0   : > { %s593_s21 = sshll.u32 %s440_s10, 7  ;;  %p929_p5 = por %p928_p8, %p927_p1 }
 0x1a1   : > { %s1479_s29 = scalar_lea.hbm %s1627_s30, %s593_s21  ;;  %p922_p11 = pnand %p921_p3, %p1628_p4 }
 0x1a3   : > { %p923_p10 = pneg %p922_p11 }
 0x1a5   : > { %p930_p7 = pnand %p929_p5, %p923_p10 }
 0x1a7   : > { %933 = shalt.err (!%p930_p7)
}
 0x1a8   : > { %s934_s26 = scalar_lea.hbm %s1479_s29, 512  ;;  %s938_s0 = scalar_lea.hbm %s1627_s30, 2048 }
 0x1a9   : > { %p935_p9 = scmp.ne.s32.totalorder %s1479_s29, %s934_s26  ;;  %p939_p2 = scmp.lt.u32.totalorder %s1479_s29, %s1627_s30 }
 0x1aa   : > { %p940_p13 = scmp.lt.u32.totalorder %s938_s0, %s934_s26  ;;  %p942_p3 = scmp.lt.u32.totalorder %s934_s26, %s1479_s29 }
 0x1ab   : > { %p936_p12 = pnand %p935_p9, %p1628_p4 }
 0x1ac   : > { %p941_p0 = por %p940_p13, %p939_p2 }
 0x1ad   : > { %p937_p6 = pneg %p936_p12 }
 0x1ae   : > { %p943_p11 = por %p942_p3, %p941_p0 }
 0x1b0   : > { %p944_p10 = pnand %p943_p11, %p937_p6 }
 0x1b2   : > { %947 = shalt.err (!%p944_p10)
}
 0x1b3   : > { %s1096_s23 = smov 128   ;;  %s1097_s2 = smov 256  }
 0x1b4   : > { %s1098_s5 = smov 8  }
 0x1b5   : > { %709 = dma.vmem_to_hbm [thread:$0]  (%p1628_p4), %s1474_s9, 512, %s1479_s29, %s1483_s4, %s1096_s23, %s1097_s2, %s1098_s5  }
 0x1b6 PF: > { %p723_p1 = scmp.ge.s32.totalorder %s1086_s27, 2  ;;  %s458_s11 = sand.u32 1, %s1026_s12  }
 0x1b7   : > { %p1629_p8 = scmp.ne.s32.totalorder %s1612_s22, 0  ;;  %s459_s3 = scalar_lea.sflag [#allocation4], %s458_s11 }
 0x1b9   : > { %p719_p5 = pnand %p723_p1, %p1629_p8 }
 0x1bb   : > { %1021 = dma.done.wait (!%p719_p5), %s459_s3, 512  }
 0x1bc   : > { %1023 = vsyncadd (!%p719_p5), %s459_s3, 4294966784  ;;  %s22_s27 = sadd.s32 1, %s1086_s27   ;;  %s1631_s9 = sld [smem:[#allocation19_spill]] }
 0x1bd   : > { %p1512_p7 = scmp.ge.s32.totalorder %s22_s27, 14   ;;  %s1632_s23 = sld [smem:[#allocation14_spill]] }
 0x1be   : > { %s1633_s29 = sld [smem:[#allocation15_spill]]  ;;  %s1634_s4 = sld [smem:[#allocation16_spill]] }
 0x1bf   : > { %s1635_s26 = sld [smem:[#allocation18_spill]]  ;;  %s1636_s12 = smov %s1030_s13 }
 0x1c0   : > { %s1637_s13 = smov %s1034_s14  ;;  %s1638_s14 = smov %s1342_s7 }
 0x1c1   : > { %s1639_s15 = smov %s1042_s16  ;;  %s1640_s16 = smov %s1046_s17 }
 0x1c2   : > { %s1641_s17 = smov %s1631_s9  ;;  %s1642_s18 = smov %s1054_s19 }
 0x1c3   : > { %s1643_s19 = smov %s1058_s20  ;;  %s1644_s20 = smov %s1339_s28 }
 0x1c4   : > { %s1645_s21 = smov %s1074_s24  ;;  %s1646_s22 = smov %s1078_s25 }
 0x1c5   : > { %s1647_s24 = smov %s1633_s29  ;;  %s1648_s25 = smov %s1634_s4 }
 0x1c6   :  { %21 = sbr.rel (!%p1512_p7) target bundleno = 17 (0x11), region = 101 }
 0x1cd   :  { %464 = vsyncpa [#allocation3], 1 }
 0x1ce   :  { %466 = vsyncpa [#allocation3 + $0x1], 1 }
 0x1cf   :  { %467 = vsyncpa [#allocation6], 1 }
 0x1d0   :  { %469 = vsyncpa [#allocation6 + $0x1], 1 }
 0x1d1   :  { %470 = vsyncpa [#allocation4], 1 }
 0x1d2   :  { %472 = vsyncpa [#allocation4 + $0x1], 1 }

</bundles_post_ra>
